<compile_context>
chip_gen: v7x
topology: tpu7x:2x2x1
jax: 0.10.0
libtpu: 0.0.40
codegen_flags: <defaults>
</compile_context>

<pallas_src>
import functools
import math

import jax
import jax.numpy as jnp
from jax.experimental import pallas as pl
from jax.experimental.pallas import tpu as pltpu


def _finalize(sum_lg, sum_bx, cls_t_ref, box_t_ref, out_ref, *, c, n_total, b_total):
    """Per-B-tile epilogue: lane fold -> N-means -> CE + 100*L1 contribution.

    sum_lg : (TB, 128) fp32 lane-wise sums of the flattened (N*C) logits
    sum_bx : (TB, 128) fp32 lane-wise sums of the flattened (N*4) boxes
    """
    inv_n = 1.0 / n_total

    # Fold the 128 interleaved lanes to per-class / per-coordinate sums.
    # Lane l of a group holds flat index (g*128 + l) -> class/coord = l % C (128 % C == 0).
    if c == 1:
        sum_lg_c = jnp.sum(sum_lg, axis=-1, keepdims=True)                    # (TB, 1)
    else:
        lane_c = jax.lax.broadcasted_iota(jnp.int32, (128, c), 0)
        col_c = jax.lax.broadcasted_iota(jnp.int32, (128, c), 1)
        fold_c = (lane_c % c == col_c).astype(jnp.float32)                    # (128, C)
        sum_lg_c = jnp.dot(sum_lg, fold_c, preferred_element_type=jnp.float32)

    lane4 = jax.lax.broadcasted_iota(jnp.int32, (128, 4), 0)
    col4 = jax.lax.broadcasted_iota(jnp.int32, (128, 4), 1)
    fold_4 = (lane4 % 4 == col4).astype(jnp.float32)                          # (128, 4)
    sum_bx_c = jnp.dot(sum_bx, fold_4, preferred_element_type=jnp.float32)    # (TB, 4)

    mean_lg = sum_lg_c * inv_n                                                # (TB, C)
    mean_bx = sum_bx_c * inv_n                                                # (TB, 4)

    # Soft-target cross entropy over C (with C == 1 the log-softmax is exactly 0,
    # matching the PyTorch module, but the code stays general).
    m = jnp.max(mean_lg, axis=-1, keepdims=True)
    lse = m + jnp.log(jnp.sum(jnp.exp(mean_lg - m), axis=-1, keepdims=True))
    log_sm = mean_lg - lse
    ce_sum = -jnp.sum(cls_t_ref[...].astype(jnp.float32) * log_sm)

    # L1 on the N-mean boxes, scaled by 100.
    l1_sum = jnp.sum(jnp.abs(mean_bx - box_t_ref[...].astype(jnp.float32)))

    # NOTE: the module's `0 * BCEWithLogits(...)` objectness term is identically
    # zero for finite objectness logits and is intentionally elided (dead compute).
    contrib = ce_sum / b_total + 100.0 * l1_sum / (b_total * 4.0)
    out_ref[...] = jnp.full(out_ref.shape, contrib, dtype=out_ref.dtype)


def _owlv2_loss_kernel(logits_ref, cls_t_ref, boxes_ref, box_t_ref, out_ref,
                       *acc_refs, c, n_total, b_total, single_step):
    """Grid = (B tiles [parallel], N-group tiles [arbitrary]).

    logits_ref : (TB, TGl, 128) lane-dense group slab of logits (flattened N*C)
    cls_t_ref  : (TB, C)        soft-target class labels (resident per B tile)
    boxes_ref  : (TB, TGb, 128) lane-dense group slab of boxes (flattened N*4)
    box_t_ref  : (TB, 4)        bbox labels (resident per B tile)
    out_ref    : (1, 8, 128)    per-B-tile partial loss, broadcast over the block
    acc_*      : (TB, 128) fp32 lane-wise running sums (only when nk > 1)
    """
    if single_step:
        # Whole N axis in one block: no accumulators, no pl.when.
        sum_lg = jnp.sum(logits_ref[...].astype(jnp.float32), axis=1)   # (TB, 128)
        sum_bx = jnp.sum(boxes_ref[...].astype(jnp.float32), axis=1)    # (TB, 128)
        _finalize(sum_lg, sum_bx, cls_t_ref, box_t_ref, out_ref,
                  c=c, n_total=n_total, b_total=b_total)
    else:
        acc_lg_ref, acc_bx_ref = acc_refs
        k = pl.program_id(1)

        @pl.when(k == 0)
        def _():
            acc_lg_ref[...] = jnp.zeros_like(acc_lg_ref)
            acc_bx_ref[...] = jnp.zeros_like(acc_bx_ref)

        # Lane-wise accumulation (VPU adds); cross-lane work deferred to finalize.
        acc_lg_ref[...] += jnp.sum(logits_ref[...].astype(jnp.float32), axis=1)
        acc_bx_ref[...] += jnp.sum(boxes_ref[...].astype(jnp.float32), axis=1)

        @pl.when(k == pl.num_programs(1) - 1)
        def _():
            _finalize(acc_lg_ref[...], acc_bx_ref[...], cls_t_ref, box_t_ref,
                      out_ref, c=c, n_total=n_total, b_total=b_total)


def owlv2_loss(logits, class_labels, obj_logits, obj_labels, pred_boxes, bbox_labels):
    """JAX glue + pallas_call. Mirrors OWLv2LossFunction.forward (IS_IMAGE_QUERY=False)."""
    # The 0 * objectness loss term is exactly 0 for finite logits -> not even DMA'd.
    del obj_logits, obj_labels

    logits = jnp.squeeze(logits, axis=1)              # (B, N, C)
    pred_boxes = jnp.squeeze(pred_boxes, axis=1)      # (B, N, 4)
    B, N, C = logits.shape
    # TODO(synk): lane fold assumes C divides 128 (the module itself forces C == 1).
    assert 128 % C == 0, "owlv2_loss kernel requires C to divide 128"

    # Zero-pad N (sum-preserving; means divide by the true N) so the flattened last
    # dims split into dense 128-lane groups.  No-op for aligned N (no HBM copy).
    def _lcm(a, b):
        return a * b // math.gcd(a, b)

    n_align = _lcm(128 // math.gcd(C, 128), 32)
    N_pad = ((N + n_align - 1) // n_align) * n_align
    if N_pad != N:
        pad = N_pad - N
        logits = jnp.pad(logits, ((0, 0), (0, pad), (0, 0)))
        pred_boxes = jnp.pad(pred_boxes, ((0, 0), (0, pad), (0, 0)))

    # Pure (bitcast) reshapes: (B, N, C) -> (B, G, 128) with lanes fully dense.
    Gl = N_pad * C // 128
    Gb = N_pad * 4 // 128
    logits_g = logits.reshape(B, Gl, 128)
    boxes_g = pred_boxes.reshape(B, Gb, 128)
    cls_t = class_labels.astype(jnp.float32).reshape(B, C)
    box_t = bbox_labels.astype(jnp.float32).reshape(B, 4)

    # B tiling: keep nb >= 2 when legal so the "parallel" axis feeds both v7x TCs.
    if B % 16 == 0:
        TB = B // 2
    elif B % 8 == 0 and B > 8:
        TB = 8
    else:
        TB = B
    nb = B // TB

    # N-group tiling from a VMEM budget (double-buffered inputs dominate).
    lg_item = logits_g.dtype.itemsize
    bx_item = boxes_g.dtype.itemsize
    budget = 24 * 1024 * 1024  # conservative for v7x (64 MiB physical VMEM)

    def working_set_bytes(nk_):
        return 2 * TB * 128 * ((Gl // nk_) * lg_item + (Gb // nk_) * bx_item)

    nk = 1
    for cand in (1, 2, 4, 8, 16, 32, 64):
        if Gl % cand or Gb % cand:
            continue
        if cand > 1 and ((Gl // cand) % 8 or (Gb // cand) % 8):
            continue
        nk = cand
        if working_set_bytes(cand) <= budget:
            break
    TGl, TGb = Gl // nk, Gb // nk

    kernel = functools.partial(_owlv2_loss_kernel, c=C, n_total=float(N),
                               b_total=float(B), single_step=(nk == 1))

    scratch_shapes = [] if nk == 1 else [pltpu.VMEM((TB, 128), jnp.float32),
                                         pltpu.VMEM((TB, 128), jnp.float32)]

    bytes_accessed = (logits_g.size * lg_item + boxes_g.size * bx_item
                      + cls_t.size * 4 + box_t.size * 4 + nb * 8 * 128 * 4)
    cost = pl.CostEstimate(flops=int(2 * B * N_pad * (C + 4) + 64 * B * (C + 4)),
                           transcendentals=int(B * C),
                           bytes_accessed=int(bytes_accessed))

    working = (working_set_bytes(nk) + cls_t.size * 4 + box_t.size * 4
               + 2 * TB * 128 * 4 + 2 * 8 * 128 * 4)
    vmem_limit = int(min(max(2 * working, 32 * 1024 * 1024), 48 * 1024 * 1024))

    out = pl.pallas_call(
        kernel,
        out_shape=jax.ShapeDtypeStruct((nb, 8, 128), jnp.float32),
        grid_spec=pltpu.PrefetchScalarGridSpec(
            num_scalar_prefetch=0,
            grid=(nb, nk),
            in_specs=[
                pl.BlockSpec((TB, TGl, 128), lambda i, k: (i, k, 0)),  # logits groups
                pl.BlockSpec((TB, C),        lambda i, k: (i, 0)),     # class labels (resident)
                pl.BlockSpec((TB, TGb, 128), lambda i, k: (i, k, 0)),  # box groups
                pl.BlockSpec((TB, 4),        lambda i, k: (i, 0)),     # bbox labels (resident)
            ],
            out_specs=pl.BlockSpec((1, 8, 128), lambda i, k: (i, 0, 0)),
            scratch_shapes=scratch_shapes,
        ),
        compiler_params=pltpu.CompilerParams(
            dimension_semantics=("parallel", "arbitrary"),
            vmem_limit_bytes=vmem_limit),
        cost_estimate=cost,
    )(logits_g, cls_t, boxes_g, box_t)

    # Sum the per-B-tile partial losses (already divided by B / (B*4) in-kernel).
    return jnp.sum(out[:, 0, 0])


def owlv2_loss_ref(logits, class_labels, obj_logits, obj_labels, pred_boxes, bbox_labels):
    """Pure-JAX reference (includes the 0 * BCE term for semantic parity)."""
    x = jnp.mean(jnp.squeeze(logits, axis=1), axis=1)                    # (B, C)
    log_sm = x - jax.scipy.special.logsumexp(x, axis=1, keepdims=True)
    ce = jnp.mean(-jnp.sum(class_labels.astype(jnp.float32) * log_sm, axis=1))

    o = jnp.mean(jnp.squeeze(obj_logits, axis=1), axis=1)                # (B,)
    t = obj_labels.astype(jnp.float32)
    bce = jnp.mean(jnp.maximum(o, 0.0) - o * t + jnp.log1p(jnp.exp(-jnp.abs(o))))

    b = jnp.mean(jnp.squeeze(pred_boxes, axis=1), axis=1)                # (B, 4)
    l1 = jnp.mean(jnp.abs(b - bbox_labels.astype(jnp.float32)))
    return ce + 0.0 * bce + 100.0 * l1


if __name__ == "__main__":
    key = jax.random.PRNGKey(0)
    k1, k2, k3, k4, k5, k6 = jax.random.split(key, 6)

    # Small shapes consistent with the module's forward:
    #   B images, N query patches, C=1 class logit (PyTorch's soft-target CE path
    #   requires target.shape == input.shape, and class_labels is (B, 1)).
    B, N, C = 16, 2048, 1

    logits = jax.random.normal(k1, (B, 1, N, C), dtype=jnp.float32)          # outputs['logits']
    category_ids = jax.random.randint(k2, (B,), 0, 10)                       # t['category_id']
    class_labels = category_ids.astype(jnp.float32).reshape(B, 1)            # float, unsqueeze(1)

    obj_logits = jax.random.normal(k3, (B, 1, N), dtype=jnp.float32)         # outputs['objectness_logits']
    obj_labels = jax.random.bernoulli(k4, 0.5, (B,)).astype(jnp.float32)     # t['objectness']

    pred_boxes = jax.random.uniform(k5, (B, 1, N, 4), dtype=jnp.float32)     # outputs['pred_boxes']
    bbox_labels = jax.random.uniform(k6, (B, 4), dtype=jnp.float32)          # t['bbox']

    loss = owlv2_loss(logits, class_labels, obj_logits, obj_labels,
                      pred_boxes, bbox_labels)
    loss = jax.block_until_ready(loss)

    ref = owlv2_loss_ref(logits, class_labels, obj_logits, obj_labels,
                         pred_boxes, bbox_labels)
    ref = jax.block_until_ready(ref)

    assert jnp.allclose(loss, ref, rtol=1e-5, atol=1e-4), (loss, ref)
    print("KERNEL_OK")
</pallas_src>

<mosaic_0001>
module attributes {stable_mosaic.version = 11 : i64} {
  func.func @_owlv2_loss_kernel(%arg0: i32, %arg1: i32, %arg2: memref<8x16x128xf32, #tpu.memory_space<vmem>>, %arg3: memref<8x1xf32, #tpu.memory_space<vmem>>, %arg4: memref<8x64x128xf32, #tpu.memory_space<vmem>>, %arg5: memref<8x4xf32, #tpu.memory_space<vmem>>, %arg6: memref<1x8x128xf32, #tpu.memory_space<vmem>>) attributes {dimension_semantics = [#tpu.dimension_semantics<parallel>, #tpu.dimension_semantics<arbitrary>], iteration_bounds = array<i64: 2, 1>, scalar_prefetch = 0 : i64, scratch_operands = 0 : i64, tpu.core_type = #tpu.core_type<tc>, window_params = [{transform_indices = @transform_0, window_bounds = array<i64: 8, 16, 128>}, {transform_indices = @transform_1, window_bounds = array<i64: 8, 1>}, {transform_indices = @transform_2, window_bounds = array<i64: 8, 64, 128>}, {transform_indices = @transform_3, window_bounds = array<i64: 8, 4>}, {transform_indices = @transform_4, window_bounds = array<i64: 1, 8, 128>}]} {
    %c0 = arith.constant 0 : index
    %c0_0 = arith.constant 0 : index
    %c0_1 = arith.constant 0 : index
    %0 = vector.load %arg2[%c0, %c0_0, %c0_1] : memref<8x16x128xf32, #tpu.memory_space<vmem>>, vector<8x16x128xf32>
    %cst = arith.constant dense<0.000000e+00> : vector<8x128xf32>
    %1 = vector.multi_reduction <add>, %0, %cst [1] : vector<8x16x128xf32> to vector<8x128xf32>
    %c0_2 = arith.constant 0 : index
    %c0_3 = arith.constant 0 : index
    %c0_4 = arith.constant 0 : index
    %2 = vector.load %arg4[%c0_2, %c0_3, %c0_4] : memref<8x64x128xf32, #tpu.memory_space<vmem>>, vector<8x64x128xf32>
    %cst_5 = arith.constant dense<0.000000e+00> : vector<8x128xf32>
    %3 = vector.multi_reduction <add>, %2, %cst_5 [1] : vector<8x64x128xf32> to vector<8x128xf32>
    %cst_6 = arith.constant dense<0.000000e+00> : vector<8xf32>
    %4 = vector.multi_reduction <add>, %1, %cst_6 [1] : vector<8x128xf32> to vector<8xf32>
    %5 = vector.shape_cast %4 : vector<8xf32> to vector<8x1xf32>
    %6 = tpu.iota {dimensions = array<i32: 0>} : vector<128x4xi32>
    %7 = tpu.iota {dimensions = array<i32: 1>} : vector<128x4xi32>
    %c4_i32 = arith.constant 4 : i32
    %c0_i32 = arith.constant 0 : i32
    %8 = arith.cmpi eq, %c4_i32, %c0_i32 : i32
    %c1_i32 = arith.constant 1 : i32
    %9 = arith.select %8, %c1_i32, %c4_i32 : i32
    %10 = vector.broadcast %9 : i32 to vector<128x4xi32>
    %11 = arith.remsi %6, %10 : vector<128x4xi32>
    %c0_i32_7 = arith.constant 0 : i32
    %12 = vector.broadcast %c0_i32_7 : i32 to vector<128x4xi32>
    %13 = arith.cmpi ne, %11, %12 : vector<128x4xi32>
    %c0_i32_8 = arith.constant 0 : i32
    %14 = vector.broadcast %c0_i32_8 : i32 to vector<128x4xi32>
    %15 = arith.cmpi slt, %11, %14 : vector<128x4xi32>
    %c0_i32_9 = arith.constant 0 : i32
    %16 = arith.cmpi slt, %9, %c0_i32_9 : i32
    %17 = vector.broadcast %16 : i1 to vector<128x4xi1>
    %18 = vector.broadcast %17 : vector<128x4xi1> to vector<128x4xi1>
    %19 = arith.xori %15, %18 : vector<128x4xi1>
    %20 = arith.andi %19, %13 : vector<128x4xi1>
    %21 = vector.broadcast %9 : i32 to vector<128x4xi32>
    %22 = arith.addi %11, %21 : vector<128x4xi32>
    %23 = arith.select %20, %22, %11 : vector<128x4xi1>, vector<128x4xi32>
    %24 = arith.cmpi eq, %23, %7 : vector<128x4xi32>
    %25 = arith.extui %24 : vector<128x4xi1> to vector<128x4xi32>
    %26 = arith.sitofp %25 : vector<128x4xi32> to vector<128x4xf32>
    %cst_10 = arith.constant dense<0.000000e+00> : vector<8x4xf32>
    %27 = tpu.matmul %3, %26, %cst_10 {dimension_numbers = #tpu.dot_dimension_numbers<[1], [0], [0], [1], [0, 0, 1, 1], [], []>} : vector<8x128xf32>, vector<128x4xf32>, vector<8x4xf32> -> vector<8x4xf32>
    %cst_11 = arith.constant 4.8828125E-4 : f32
    %28 = vector.broadcast %cst_11 : f32 to vector<8x1xf32>
    %29 = arith.mulf %5, %28 : vector<8x1xf32>
    %cst_12 = arith.constant 4.8828125E-4 : f32
    %30 = vector.broadcast %cst_12 : f32 to vector<8x4xf32>
    %31 = arith.mulf %27, %30 : vector<8x4xf32>
    %cst_13 = arith.constant dense<0xFF800000> : vector<8xf32>
    %32 = vector.multi_reduction <maximumf>, %29, %cst_13 [1] : vector<8x1xf32> to vector<8xf32>
    %33 = vector.shape_cast %32 : vector<8xf32> to vector<8x1xf32>
    %34 = arith.subf %29, %33 : vector<8x1xf32>
    %35 = math.exp %34 : vector<8x1xf32>
    %cst_14 = arith.constant dense<0.000000e+00> : vector<8xf32>
    %36 = vector.multi_reduction <add>, %35, %cst_14 [1] : vector<8x1xf32> to vector<8xf32>
    %37 = vector.shape_cast %36 : vector<8xf32> to vector<8x1xf32>
    %38 = math.log %37 : vector<8x1xf32>
    %39 = arith.addf %33, %38 : vector<8x1xf32>
    %40 = arith.subf %29, %39 : vector<8x1xf32>
    %c0_15 = arith.constant 0 : index
    %c0_16 = arith.constant 0 : index
    %41 = vector.load %arg3[%c0_15, %c0_16] : memref<8x1xf32, #tpu.memory_space<vmem>>, vector<8x1xf32>
    %42 = arith.mulf %41, %40 : vector<8x1xf32>
    %43 = vector.shape_cast %42 : vector<8x1xf32> to vector<1x8x1xf32>
    %cst_17 = arith.constant dense<0.000000e+00> : vector<1xf32>
    %44 = vector.multi_reduction <add>, %43, %cst_17 [1, 2] : vector<1x8x1xf32> to vector<1xf32>
    %45 = vector.shape_cast %44 : vector<1xf32> to vector<1x1x1xf32>
    %46 = vector.extract %45[0, 0, 0] : f32 from vector<1x1x1xf32>
    %cst_18 = arith.constant 0.000000e+00 : f32
    %47 = arith.subf %cst_18, %46 : f32
    %c0_19 = arith.constant 0 : index
    %c0_20 = arith.constant 0 : index
    %48 = vector.load %arg5[%c0_19, %c0_20] : memref<8x4xf32, #tpu.memory_space<vmem>>, vector<8x4xf32>
    %49 = arith.subf %31, %48 : vector<8x4xf32>
    %50 = math.absf %49 : vector<8x4xf32>
    %51 = vector.shape_cast %50 : vector<8x4xf32> to vector<1x8x4xf32>
    %cst_21 = arith.constant dense<0.000000e+00> : vector<1xf32>
    %52 = vector.multi_reduction <add>, %51, %cst_21 [1, 2] : vector<1x8x4xf32> to vector<1xf32>
    %53 = vector.shape_cast %52 : vector<1xf32> to vector<1x1x1xf32>
    %54 = vector.extract %53[0, 0, 0] : f32 from vector<1x1x1xf32>
    %cst_22 = arith.constant 1.600000e+01 : f32
    %55 = arith.divf %47, %cst_22 : f32
    %cst_23 = arith.constant 1.000000e+02 : f32
    %56 = arith.mulf %cst_23, %54 : f32
    %cst_24 = arith.constant 6.400000e+01 : f32
    %57 = arith.divf %56, %cst_24 : f32
    %58 = arith.addf %55, %57 : f32
    %59 = vector.broadcast %58 : f32 to vector<1x8x128xf32>
    %c0_25 = arith.constant 0 : index
    %c0_26 = arith.constant 0 : index
    %c0_27 = arith.constant 0 : index
    %60 = vector.load %arg6[%c0_25, %c0_26, %c0_27] : memref<1x8x128xf32, #tpu.memory_space<vmem>>, vector<1x8x128xf32>
    tpu.vector_store %arg6[%c0_25, %c0_26, %c0_27], %59 {strides = array<i32>} : memref<1x8x128xf32, #tpu.memory_space<vmem>>, vector<1x8x128xf32>,
    return
  }
  func.func @transform_0(%arg0: i32, %arg1: i32) -> (i32, i32, i32) {
    %c0_i32 = arith.constant 0 : i32
    %c0_i32_0 = arith.constant 0 : i32
    return %arg0, %arg1, %c0_i32 : i32, i32, i32
  }
  func.func @transform_1(%arg0: i32, %arg1: i32) -> (i32, i32) {
    %c0_i32 = arith.constant 0 : i32
    %c0_i32_0 = arith.constant 0 : i32
    return %arg0, %c0_i32 : i32, i32
  }
  func.func @transform_2(%arg0: i32, %arg1: i32) -> (i32, i32, i32) {
    %c0_i32 = arith.constant 0 : i32
    %c0_i32_0 = arith.constant 0 : i32
    return %arg0, %arg1, %c0_i32 : i32, i32, i32
  }
  func.func @transform_3(%arg0: i32, %arg1: i32) -> (i32, i32) {
    %c0_i32 = arith.constant 0 : i32
    %c0_i32_0 = arith.constant 0 : i32
    return %arg0, %c0_i32 : i32, i32
  }
  func.func @transform_4(%arg0: i32, %arg1: i32) -> (i32, i32, i32) {
    %c0_i32 = arith.constant 0 : i32
    %c0_i32_0 = arith.constant 0 : i32
    %c0_i32_1 = arith.constant 0 : i32
    return %arg0, %c0_i32, %c0_i32_0 : i32, i32, i32
  }
}

</mosaic_0001>

<bundles_post_ra>
// kernel: tpu_custom_call.1
= control target key start
LH: loop header
LB: loop body
LE: loop exit
PB: predicated region body
PF: predicated region fallthrough
CT: control target
= control target key end

     0   :  { %9 = vsyncpa [#allocation3], 0  ;;  %s2009_s0 = inlined_call_operand.hbm [shape: f32[16,16,128], index: 0, kind: input, shape index: {}]   ;;  %s2010_s1 = inlined_call_operand.vmem [shape: f32[16,1], index: 1, kind: input, shape index: {}]   ;;  %s2011_s2 = inlined_call_operand.hbm [shape: f32[16,64,128], index: 2, kind: input, shape index: {}]   ;;  %s2012_s3 = inlined_call_operand.vmem [shape: f32[16,4], index: 3, kind: input, shape index: {}]   ;;  %s2013_s4 = inlined_call_operand.hbm [shape: f32[2,8,128], index: 4, kind: output, shape index: {}]  }
   0x1   :  { %11 = vsyncpa [#allocation3 + $0x1], 0 }
   0x2   :  { %12 = vsyncpa [#allocation6], 0 }
   0x3   :  { %14 = vsyncpa [#allocation6 + $0x1], 0 }
   0x4   :  { %15 = vsyncpa [#allocation4], 0 }
   0x5   :  { %17 = vsyncpa [#allocation4 + $0x1], 0  ;;  %s1513_s15 = smov 0   ;;  %s1515_s16 = smov 0  }
   0x6   :  { %s1517_s17 = smov 0   ;;  %s1519_s18 = smov 0  }
   0x7   :  { %s1521_s19 = smov 0   ;;  %s1523_s20 = smov 0  }
   0x8 LB: > { %s1116_s21 = sadd.s32 4294967295, %s1477_s20   ;;  %s1117_s22 = sadd.s32 4294967294, %s1477_s20   ;;  %s1477_s20 = sphi %s1523_s20, %s23_s20   ;;  %s1473_s19 = sphi %s1521_s19, %s2061_s19   ;;  %s1469_s18 = sphi %s1519_s18, %s2060_s18   ;;  %s1465_s17 = sphi %s1517_s17, %s2059_s17   ;;  %s1461_s16 = sphi %s1515_s16, %s2058_s16   ;;  %s1457_s15 = sphi %s1513_s15, %s2057_s15  }
   0x9   : > { %s35_s23 = sadd.s32 1, %s1473_s19  ;;  %s44_s24 = sadd.s32 1, %s1465_s17 }
   0xa   : > { %p37_p0 = scmp.ge.s32.totalorder %s35_s23, 2  ;;  %p51_p1 = scmp.ne.s32.totalorder %s1465_s17, %s1461_s16 }
   0xb   : > { %p52_p2 = scmp.eq.s32.totalorder %s1477_s20, 0  ;;  %p57_p3 = scmp.ne.s32.totalorder %s1461_s16, %s1457_s15 }
   0xc   : > { %s2063_s23 = smov (%p37_p0, %s35_s23), 0  ;;  %p58_p5 = scmp.eq.s32.totalorder %s1116_s21, 0 }
   0xd   : > { %p1554_p4 = por %p52_p2, %p51_p1  ;;  %s39_s26 = ssub.s32 %s1473_s19, %s2063_s23 }
   0xe   : > { %p161_p6 = scmp.eq.s32.totalorder %s1116_s21, 1  ;;  %p42_p7 = scmp.eq.s32.totalorder %s39_s26, 0 }
   0xf   : > { %p1560_p8 = por %p58_p5, %p57_p3  ;;  %p167_p10 = scmp.eq.s32.totalorder %s1117_s22, 1 }
  0x10   : > { %p1564_p9 = por %p161_p6, %p51_p1  ;;  %p1271_p13 = scmp.lt.s32.totalorder %s1477_s20, 2 }
  0x11   : > { %s2018_s27 = scalar_select %p1560_p8, 1, 0 }
  0x12   : > { %s2019_s28 = scalar_select %p1564_p9, 1, 0 }
  0x13   : > { %s1569_s29 = scalar_select %p42_p7, %s1465_s17, %s44_s24  }
  0x14   : > { %p1571_p11 = por %p167_p10, %p57_p3  ;;  %s1578_s5 = sand.u32 1, %s1465_s17  }
  0x15   : > { %s1120_s6 = sshll.u32 %s1578_s5, 7  ;;  %s1171_s7 = sshll.u32 %s1473_s19, 11 }
  0x16   : > { %s2020_s30 = scalar_select %p1571_p11, 1, 0 }
  0x17   : > { %s1585_s10 = scalar_lea.hbm %s2009_s0, %s1171_s7  ;;  %s191_s11 = scalar_lea.vmem [#allocation2], %s1120_s6 }
  0x18   : > { %s201_s12 = sshll.u32 %s191_s11, 4  ;;  %p1591_p0 = pnand %p1271_p13, %p1554_p4  ;;  %s1587_s12 = int_to_ptr.vmem [resolvable:$true] %s201_s12 }
  0x19   : > { %s188_s14 = scalar_lea.sflag [#allocation3], %s1578_s5  ;;  %s1331_s21 = scalar_lea.hbm %s1585_s10, 2048 }
  0x1a   : > { %p1332_p2 = scmp.ne.s32.totalorder %s1585_s10, %s1331_s21  ;;  %p1333_p3 = pneg %p1591_p0 }
  0x1b   : > { %s1336_s25 = scalar_lea.hbm %s2009_s0, 4096  ;;  %p1337_p4 = scmp.lt.u32.totalorder %s1585_s10, %s2009_s0 }
  0x1c   : > { %p1334_p5 = pnand %p1333_p3, %p1332_p2  ;;  %p1338_p7 = scmp.lt.u32.totalorder %s1336_s25, %s1331_s21 }
  0x1d   : > { %p1340_p13 = scmp.lt.u32.totalorder %s1331_s21, %s1585_s10 }
  0x1e   : > { %p1335_p6 = pneg %p1334_p5  ;;  %p1339_p10 = por %p1338_p7, %p1337_p4 }
  0x20   : > { %p1341_p12 = por %p1340_p13, %p1339_p10 }
  0x22   : > { %p1342_p1 = pnand %p1341_p12, %p1335_p6 }
  0x24   : > { %1345 = shalt.err (!%p1342_p1)
}
  0x25   : > { %s1346_s7 = scalar_lea.vmem %s1587_s12, 2048  ;;  %s1479_s8 = smov [#allocation2]  }
  0x26   : > { %p1347_p2 = scmp.ne.s32.totalorder %s1587_s12, %s1346_s7  ;;  %s1351_s9 = sshll.u32 %s1479_s8, 4  ;;  %s1352_s9 = int_to_ptr.vmem [resolvable:$false] %s1351_s9 }
  0x27   : > { %s1353_s11 = scalar_lea.vmem %s1352_s9, 4096  ;;  %p1354_p9 = scmp.lt.s32.totalorder %s1587_s12, %s1352_s9 }
  0x28   : > { %p1349_p5 = pnand %p1347_p2, %p1333_p3  ;;  %p1355_p4 = scmp.lt.s32.totalorder %s1353_s11, %s1346_s7 }
  0x2a   : > { %p1350_p11 = pneg %p1349_p5  ;;  %p1356_p7 = por %p1355_p4, %p1354_p9 }
  0x2c   : > { %p1357_p10 = pnand %p1356_p7, %p1350_p11 }
  0x2e   : > { %1360 = shalt.err (!%p1357_p10)
}
  0x2f   : > { %s2015_s21 = smov 128   ;;  %s1481_s22 = smov 8  }
  0x30   : > { %1263 = dma.hbm_to_vmem [thread:$0]  (!%p1591_p0), %s1585_s10, 2048, %s1587_s12, %s188_s14, %s2015_s21, %s2015_s21, %s1481_s22  }
  0x31   : > { %p247_p9 = scmp.lt.s32.totalorder %s1477_s20, 3  ;;  %s1124_s24 = sshll.u32 %s1578_s5, 9 }
  0x32   : > { %s1173_s25 = sshll.u32 %s1473_s19, 13  ;;  %p2022_p11 = scmp.ge.s32.totalorder %s1477_s20, 1 }
  0x33   : > { %s1639_s8 = scalar_lea.hbm %s2011_s2, %s1173_s25  ;;  %s222_s9 = scalar_lea.vmem [#allocation5], %s1124_s24 }
  0x34   : > { %p1632_p12 = pnand %p2022_p11, %p247_p9  ;;  %s232_s11 = sshll.u32 %s222_s9, 4  ;;  %s1641_s11 = int_to_ptr.vmem [resolvable:$true] %s232_s11 }
  0x35   : > { %s219_s10 = scalar_lea.sflag [#allocation6], %s1578_s5  ;;  %s1361_s12 = scalar_lea.hbm %s1639_s8, 8192 }
  0x36   : > { %p1362_p1 = scmp.ne.s32.totalorder %s1639_s8, %s1361_s12  ;;  %s1366_s25 = scalar_lea.hbm %s2011_s2, 16384 }
  0x37   : > { %p1367_p2 = scmp.lt.u32.totalorder %s1639_s8, %s2011_s2  ;;  %p1368_p5 = scmp.lt.u32.totalorder %s1366_s25, %s1361_s12 }
  0x38   : > { %p1364_p6 = pnand %p1362_p1, %p1333_p3  ;;  %p1370_p7 = scmp.lt.u32.totalorder %s1361_s12, %s1639_s8 }
  0x39   : > { %p1369_p4 = por %p1368_p5, %p1367_p2 }
  0x3a   : > { %p1365_p13 = pneg %p1364_p6 }
  0x3b   : > { %p1371_p10 = por %p1370_p7, %p1369_p4 }
  0x3d   : > { %p1372_p9 = pnand %p1371_p10, %p1365_p13 }
  0x3f   : > { %1375 = shalt.err (!%p1372_p9)
}
  0x40   : > { %s1376_s24 = scalar_lea.vmem %s1641_s11, 8192  ;;  %s1482_s21 = smov [#allocation5]  }
  0x41   : > { %p1377_p11 = scmp.ne.s32.totalorder %s1641_s11, %s1376_s24  ;;  %s1381_s9 = sshll.u32 %s1482_s21, 4  ;;  %s1382_s9 = int_to_ptr.vmem [resolvable:$false] %s1381_s9 }
  0x42   : > { %s1383_s14 = scalar_lea.vmem %s1382_s9, 16384  ;;  %p1384_p8 = scmp.lt.s32.totalorder %s1641_s11, %s1382_s9 }
  0x43   : > { %p1379_p1 = pnand %p1377_p11, %p1333_p3  ;;  %p1385_p2 = scmp.lt.s32.totalorder %s1383_s14, %s1376_s24 }
  0x45   : > { %p1380_p6 = pneg %p1379_p1  ;;  %p1386_p5 = por %p1385_p2, %p1384_p8 }
  0x47   : > { %p1387_p4 = pnand %p1386_p5, %p1380_p6 }
  0x49   : > { %1390 = shalt.err (!%p1387_p4)
}
  0x4a   : > { %s2024_s12 = smov 128   ;;  %251 = sbr.rel (%p1632_p12) target bundleno = 582 (0x246), region = 36 }
  0x4b   : > { %1266 = dma.hbm_to_vmem [thread:$0]  (!%p1591_p0), %s1639_s8, 8192, %s1641_s11, %s219_s10, %s2024_s12, %s2024_s12, %s1481_s22  }
  0x4c   : > { %s1675_s25 = sand.u32 (!%p1632_p12), 1, %s1461_s16   ;;  %p2025_p8 = scmp.ne.s32.totalorder (!%p1632_p12), %s2018_s27, 0 }
  0x4d   : > { %s1129_s6 = sshll.u32 (!%p1632_p12), %s1675_s25, 7  ;;  %s254_s7 = scalar_lea.sflag (!%p1632_p12), [#allocation3], %s1675_s25 }
  0x4e   : > { %s1679_s13 = scalar_lea.vmem (!%p1632_p12), [#allocation2], %s1129_s6 }
  0x51   : > { %1444 = dma.done.wait (%p2025_p8), %s254_s7, 2048  }
  0x52   : > { %1446 = vsyncadd (%p2025_p8), %s254_s7, 4294965248  ;;  %s1130_s5 = sshll.u32 %s1675_s25, 9  ;;  %s263_s22 = scalar_lea.sflag [#allocation6], %s1675_s25 }
  0x53   : > { %s1687_s26 = scalar_lea.vmem [#allocation5], %s1130_s5 }
  0x54   : > { %1448 = dma.done.wait (%p2025_p8), %s263_s22, 8192  }
  0x55   : > { %1450 = vsyncadd (%p2025_p8), %s263_s22, 4294959104  ;;  %v581_v0 = vlaneseq  ;;  %v1483_v1 = vmov 0.0|0.0   ;;  %vm1484_vm0 = vmmov 0   ;;  %v1485_v4 = vmov 0.0   ;;  %v388_v25 = vld [vmem:[%s1687_s26] sm:$0xff]  ;;  %v389_v26 = vld [vmem:[%s1687_s26 + $0x8] sm:$0xff] }
  0x56   : > { %1226 = vmatprep.subr.bf16.mxu0 %v1483_v1  ;;  %1223 = vmatprep.mubr.msk.f32.mxu0 %vm1484_vm0, %v1485_v4  ;;  %v1486_v20 = vmov 1.0|1.0   ;;  %v390_v29 = vld [vmem:[%s1687_s26 + $0x10] sm:$0xff]  ;;  %v396_v30 = vld [vmem:[%s1687_s26 + $0x40] sm:$0xff]  ;;  %v397_v31 = vld [vmem:[%s1687_s26 + $0x48] sm:$0xff]  ;;  %v452_v37 = vadd.f32 %v389_v26, %v388_v25  ;;  %p306_p0 = scmp.lt.s32.totalorder %s1469_s18, 1 }
  0x57   : > { %v582_v2 = vshrl.u32 %v581_v0, 7  ;;  %v1694_v3 = vand.u32 127, %v581_v0  ;;  %v391_v34 = vld [vmem:[%s1687_s26 + $0x18] sm:$0xff]  ;;  %v404_v35 = vld [vmem:[%s1687_s26 + $0x80] sm:$0xff]  ;;  %v405_v36 = vld [vmem:[%s1687_s26 + $0x88] sm:$0xff]  ;;  %v465_v46 = vadd.f32 %v397_v31, %v396_v30  ;;  %s1131_s6 = sshll.u32 %s1675_s25, 3 }
  0x58   : > { %v398_v42 = vld [vmem:[%s1687_s26 + $0x50] sm:$0xff]  ;;  %v392_v44 = vld [vmem:[%s1687_s26 + $0x20] sm:$0xff]  ;;  %v453_v45 = vadd.f32 %v452_v37, %v390_v29  ;;  %v478_v47 = vadd.f32 %v405_v36, %v404_v35  ;;  %v393_v52 = vld [vmem:[%s1687_s26 + $0x28] sm:$0xff]  ;;  %s307_s27 = scalar_select %p306_p0, %s1469_s18, 1 }
  0x59   : > { %v583_v5 = vadd.s32 8, %v582_v2  ;;  %v604_v6 = vand.u32 3, %v582_v2  ;;  %v584_v7 = vadd.s32 16, %v582_v2  ;;  %v585_v8 = vadd.s32 24, %v582_v2  ;;  %v406_v43 = vld [vmem:[%s1687_s26 + $0x90] sm:$0xff]  ;;  %v399_v53 = vld [vmem:[%s1687_s26 + $0x58] sm:$0xff] }
  0x5a   : > { %v586_v9 = vadd.s32 32, %v582_v2  ;;  %v587_v10 = vadd.s32 40, %v582_v2  ;;  %v588_v11 = vadd.s32 48, %v582_v2  ;;  %v589_v16 = vadd.s32 56, %v582_v2  ;;  %v407_v54 = vld [vmem:[%s1687_s26 + $0x98] sm:$0xff]  ;;  %v412_v56 = vld [vmem:[%s1687_s26 + $0xc0] sm:$0xff] }
  0x5b   : > { %v611_v12 = vand.u32 3, %v583_v5  ;;  %vm792_vm1 = vcmp.eq.s32.totalorder %v604_v6, %v1694_v3  ;;  %v618_v13 = vand.u32 3, %v584_v7  ;;  %v625_v14 = vand.u32 3, %v585_v8  ;;  %v413_v57 = vld [vmem:[%s1687_s26 + $0xc8] sm:$0xff]  ;;  %v394_v0 = vld [vmem:[%s1687_s26 + $0x30] sm:$0xff]  ;;  %v408_v4 = vld [vmem:[%s1687_s26 + $0xa0] sm:$0xff] }
  0x5c   : > { %v632_v15 = vand.u32 3, %v586_v9  ;;  %v639_v19 = vand.u32 3, %v587_v10  ;;  %v646_v21 = vand.u32 3, %v588_v11  ;;  %v590_v22 = vadd.s32 64, %v582_v2  ;;  %v414_v5 = vld [vmem:[%s1687_s26 + $0xd0] sm:$0xff]  ;;  %v401_v7 = vld [vmem:[%s1687_s26 + $0x68] sm:$0xff] }
  0x5d   : > { %vm793_vm2 = vcmp.eq.s32.totalorder %v611_v12, %v1694_v3  ;;  %vm1699_vm3 = vcmp.eq.s32.totalorder %v618_v13, %v1694_v3  ;;  %vm1704_vm4 = vcmp.eq.s32.totalorder %v625_v14, %v1694_v3  ;;  %v653_v23 = vand.u32 3, %v589_v16  ;;  %v409_v8 = vld [vmem:[%s1687_s26 + $0xa8] sm:$0xff]  ;;  %v415_v9 = vld [vmem:[%s1687_s26 + $0xd8] sm:$0xff]  ;;  %v420_v17 = vld [vmem:[%s1687_s26 + $0x100] sm:$0xff]  ;;  %s1132_s8 = sshll.u32 %s307_s27, 3  ;;  %p2054_p12 = scmp.ne.s32.totalorder %s2019_s28, 0 }
  0x5e   : > { %vm1227_vm5 = vmpackc.low %vm793_vm2, %vm792_vm1  ;;  %v591_v24 = vadd.s32 72, %v582_v2  ;;  %vm1717_vm7 = vcmp.eq.s32.totalorder %v632_v15, %v1694_v3  ;;  %vm1722_vm8 = vcmp.eq.s32.totalorder %v639_v19, %v1694_v3  ;;  %vm1731_vm9 = vcmp.eq.s32.totalorder %v646_v21, %v1694_v3  ;;  %v395_v16 = vld [vmem:[%s1687_s26 + $0x38] sm:$0xff]  ;;  %v421_v18 = vld [vmem:[%s1687_s26 + $0x108] sm:$0xff]  ;;  %s309_s24 = scalar_lea.vmem %s2010_s1, %s1132_s8  ;;  %s315_s14 = scalar_lea.vmem %s2012_s3, %s1132_s8 }
  0x5f   : > { %1228 = vmatpush3.bf16.msk.msra.mxu0 %vm1227_vm5, %v1486_v20  ;;  %vm1230_vm6 = vmpackc.low %vm1704_vm4, %vm1699_vm3  ;;  %v660_v33 = vand.u32 3, %v590_v22  ;;  %vm1744_vm11 = vcmp.eq.s32.totalorder %v653_v23, %v1694_v3  ;;  %v592_v40 = vadd.s32 80, %v582_v2  ;;  %v593_v41 = vadd.s32 88, %v582_v2  ;;  %v422_v19 = vld [vmem:[%s1687_s26 + $0x110] sm:$0xff]  ;;  %v416_v23 = vld [vmem:[%s1687_s26 + $0xe0] sm:$0xff]  ;;  %s303_s8 = scalar_lea.vmem [#allocation7], %s1131_s6 }
  0x60   : > { %1229 = vmatprep.subr.bf16.mxu0 %v1483_v1  ;;  %vm1233_vm10 = vmpackc.low %vm1722_vm8, %vm1717_vm7  ;;  %v667_v39 = vand.u32 3, %v591_v24  ;;  %v1751_v48 = vadd.s32 96, %v582_v2  ;;  %v1753_v49 = vadd.s32 104, %v582_v2  ;;  %v1755_v50 = vadd.s32 112, %v582_v2  ;;  %v402_v22 = vld [vmem:[%s1687_s26 + $0x70] sm:$0xff]  ;;  %v403_v31 = vld [vmem:[%s1687_s26 + $0x78] sm:$0xff] }
  0x61   : > { %v1757_v51 = vadd.s32 120, %v582_v2  ;;  %vm1236_vm12 = vmpackc.low %vm1744_vm11, %vm1731_vm9  ;;  %vm1773_vm13 = vcmp.eq.s32.totalorder %v660_v33, %v1694_v3  ;;  %v454_v58 = vadd.f32 %v453_v45, %v391_v34  ;;  %v466_v59 = vadd.f32 %v465_v46, %v398_v42  ;;  %v400_v2 = vld [vmem:[%s1687_s26 + $0x60] sm:$0xff]  ;;  %v410_v32 = vld [vmem:[%s1687_s26 + $0xb0] sm:$0xff]  ;;  %s988_s11 = sshll.u32 %s303_s8, 4  ;;  %s1962_s11 = int_to_ptr.vmem [resolvable:$true] %s988_s11 }
  0x62   : > { %v479_v60 = vadd.f32 %v478_v47, %v406_v43  ;;  %vm1781_vm14 = vcmp.eq.s32.totalorder %v667_v39, %v1694_v3  ;;  %v674_v62 = vand.u32 3, %v592_v40  ;;  %v681_v63 = vand.u32 3, %v593_v41  ;;  %v423_v33 = vld [vmem:[%s1687_s26 + $0x118] sm:$0xff]  ;;  %v428_v34 = vld [vmem:[%s1687_s26 + $0x140] sm:$0xff]  ;;  %v417_v36 = vld [vmem:[%s1687_s26 + $0xe8] sm:$0xff] }
  0x63   : > { %1231 = vmatpush3.bf16.msk.msra.mxu0 %vm1230_vm6, %v1486_v20  ;;  %v491_v6 = vadd.f32 %v413_v57, %v412_v56  ;;  %v455_v10 = vadd.f32 %v454_v58, %v392_v44  ;;  %v467_v11 = vadd.f32 %v466_v59, %v399_v53  ;;  %v688_v13 = vand.u32 3, %v1751_v48  ;;  %vm1239_vm15 = vmpackc.low %vm1781_vm14, %vm1773_vm13  ;;  %v429_v37 = vld [vmem:[%s1687_s26 + $0x148] sm:$0xff]  ;;  %v430_v38 = vld [vmem:[%s1687_s26 + $0x150] sm:$0xff] }
  0x64   : > { %1232 = vmatprep.subr.bf16.mxu0 %v1483_v1  ;;  %v480_v12 = vadd.f32 %v479_v60, %v407_v54  ;;  %v695_v14 = vand.u32 3, %v1753_v49  ;;  %v702_v15 = vand.u32 3, %v1755_v50  ;;  %v504_v27 = vadd.f32 %v421_v18, %v420_v17  ;;  %v411_v45 = vld [vmem:[%s1687_s26 + $0xb8] sm:$0xff]  ;;  %v418_v46 = vld [vmem:[%s1687_s26 + $0xf0] sm:$0xff]  ;;  %v424_v47 = vld [vmem:[%s1687_s26 + $0x120] sm:$0xff] }
  0x65   : > { %v492_v21 = vadd.f32 %v491_v6, %v414_v5  ;;  %v456_v24 = vadd.f32 %v455_v10, %v393_v52  ;;  %v468_v25 = vadd.f32 %v467_v11, %v400_v2  ;;  %vm1813_vm0 = vcmp.eq.s32.totalorder %v674_v62, %v1694_v3  ;;  %v431_v50 = vld [vmem:[%s1687_s26 + $0x158] sm:$0xff]  ;;  %v437_v52 = vld [vmem:[%s1687_s26 + $0x188] sm:$0xff]  ;;  %v438_v59 = vld [vmem:[%s1687_s26 + $0x190] sm:$0xff] }
  0x66   : > { %v481_v26 = vadd.f32 %v480_v12, %v408_v4  ;;  %vm1818_vm1 = vcmp.eq.s32.totalorder %v681_v63, %v1694_v3  ;;  %v709_v30 = vand.u32 3, %v1757_v51  ;;  %v505_v42 = vadd.f32 %v504_v27, %v422_v19  ;;  %v436_v51 = vld [vmem:[%s1687_s26 + $0x180] sm:$0xff]  ;;  %v425_v58 = vld [vmem:[%s1687_s26 + $0x128] sm:$0xff]  ;;  %v419_v63 = vld [vmem:[%s1687_s26 + $0xf8] sm:$0xff] }
  0x67   : > { %1234 = vmatpush3.bf16.msk.msra.mxu0 %vm1233_vm10, %v1486_v20  ;;  %v493_v35 = vadd.f32 %v492_v21, %v415_v9  ;;  %v457_v39 = vadd.f32 %v456_v24, %v394_v0  ;;  %v469_v40 = vadd.f32 %v468_v25, %v401_v7  ;;  %vm1831_vm2 = vcmp.eq.s32.totalorder %v688_v13, %v1694_v3  ;;  %vm1242_vm4 = vmpackc.low %vm1818_vm1, %vm1813_vm0  ;;  %v432_v0 = vld [vmem:[%s1687_s26 + $0x160] sm:$0xff]  ;;  %v439_v2 = vld [vmem:[%s1687_s26 + $0x198] sm:$0xff] }
  0x68   : > { %1235 = vmatprep.subr.bf16.mxu0 %v1483_v1  ;;  %v482_v41 = vadd.f32 %v481_v26, %v409_v8  ;;  %vm1836_vm3 = vcmp.eq.s32.totalorder %v695_v14, %v1694_v3  ;;  %v517_v49 = vadd.f32 %v429_v37, %v428_v34  ;;  %v506_v57 = vadd.f32 %v505_v42, %v423_v33  ;;  %v426_v9 = vld [vmem:[%s1687_s26 + $0x130] sm:$0xff]  ;;  %v444_v10 = vld [vmem:[%s1687_s26 + $0x1c0] sm:$0xff]  ;;  %v445_v11 = vld [vmem:[%s1687_s26 + $0x1c8] sm:$0xff] }
  0x69   : > { %v494_v48 = vadd.f32 %v493_v35, %v416_v23  ;;  %v458_v53 = vadd.f32 %v457_v39, %v395_v16  ;;  %v470_v54 = vadd.f32 %v469_v40, %v402_v22  ;;  %vm1858_vm5 = vcmp.eq.s32.totalorder %v702_v15, %v1694_v3  ;;  %v433_v15 = vld [vmem:[%s1687_s26 + $0x168] sm:$0xff]  ;;  %v446_v16 = vld [vmem:[%s1687_s26 + $0x1d0] sm:$0xff]  ;;  %vm1245_vm7 = vmpackc.low %vm1836_vm3, %vm1831_vm2 }
  0x6a   : > { %v483_v56 = vadd.f32 %v482_v41, %v410_v32  ;;  %v518_v61 = vadd.f32 %v517_v49, %v430_v38  ;;  %v530_v62 = vadd.f32 %v437_v52, %v436_v51  ;;  %v507_v7 = vadd.f32 %v506_v57, %v424_v47  ;;  %v427_v22 = vld [vmem:[%s1687_s26 + $0x138] sm:$0xff]  ;;  %v434_v27 = vld [vmem:[%s1687_s26 + $0x170] sm:$0xff]  ;;  %v441_v28 = vld [vmem:[%s1687_s26 + $0x1a8] sm:$0xff] }
  0x6b   : > { %1237 = vmatpush3.bf16.msk.msra.mxu0 %vm1236_vm12, %v1486_v20  ;;  %v495_v60 = vadd.f32 %v494_v48, %v417_v36  ;;  %v459_v4 = vrot.slane %v458_v53, 4  ;;  %v471_v5 = vadd.f32 %v470_v54, %v403_v31  ;;  %vm1868_vm6 = vcmp.eq.s32.totalorder %v709_v30, %v1694_v3  ;;  %v440_v3 = vld [vmem:[%s1687_s26 + $0x1a0] sm:$0xff]  ;;  %v447_v29 = vld [vmem:[%s1687_s26 + $0x1d8] sm:$0xff]  ;;  %v442_v39 = vld [vmem:[%s1687_s26 + $0x1b0] sm:$0xff] }
  0x6c   : > { %1238 = vmatprep.subr.bf16.mxu0 %v1483_v1  ;;  %v484_v6 = vadd.f32 %v483_v56, %v411_v45  ;;  %v519_v13 = vadd.f32 %v518_v61, %v431_v50  ;;  %v531_v14 = vadd.f32 %v530_v62, %v438_v59  ;;  %v508_v21 = vadd.f32 %v507_v7, %v425_v58  ;;  %v435_v38 = vld [vmem:[%s1687_s26 + $0x178] sm:$0xff]  ;;  %v448_v40 = vld [vmem:[%s1687_s26 + $0x1e0] sm:$0xff]  ;;  %vm1248_vm11 = vmpackc.low %vm1868_vm6, %vm1858_vm5 }
  0x6d   : > { %v496_v12 = vadd.f32 %v495_v60, %v418_v46  ;;  %v460_v17 = vadd.f32 %v459_v4, %v458_v53  ;;  %v472_v18 = vrot.slane %v471_v5, 4  ;;  %v543_v26 = vadd.f32 %v445_v11, %v444_v10  ;;  %v443_v49 = vld [vmem:[%s1687_s26 + $0x1b8] sm:$0xff]  ;;  %v449_v50 = vld [vmem:[%s1687_s26 + $0x1e8] sm:$0xff]  ;;  %v316_v59 = vld [vmem:[%s1679_s13] sm:$0xff] }
  0x6e   : > { %v485_v19 = vrot.slane %v484_v6, 4  ;;  %v520_v24 = vadd.f32 %v519_v13, %v432_v0  ;;  %v532_v25 = vadd.f32 %v531_v14, %v439_v2  ;;  %vm564_vm8 = vcmask 1041409   ;;  %v317_v60 = vld [vmem:[%s1679_s13 + $0x8] sm:$0xff]  ;;  %v450_v61 = vld [vmem:[%s1687_s26 + $0x1f0] sm:$0xff]  ;;  %v319_v10 = vld [vmem:[%s1679_s13 + $0x18] sm:$0xff] }
  0x6f   : > { %1240 = vmatpush3.bf16.msk.msra.mxu0 %vm1239_vm15, %v1486_v20  ;;  %v497_v23 = vadd.f32 %v496_v12, %v419_v63  ;;  %v461_v30 = vrot.slane %v460_v17, 2  ;;  %v473_v31 = vadd.f32 %v472_v18, %v471_v5  ;;  %v509_v33 = vadd.f32 %v508_v21, %v426_v9  ;;  %v318_v9 = vld [vmem:[%s1679_s13 + $0x10] sm:$0xff]  ;;  %v451_v11 = vld [vmem:[%s1687_s26 + $0x1f8] sm:$0xff]  ;;  %s1167_s26 = sshll.u32 %s1469_s18, 7  ;;  %s1487_s18 = smov [#allocation7]  }
  0x70   : > { %1241 = vmatprep.subr.bf16.mxu0 %v1483_v1  ;;  %v486_v32 = vadd.f32 %v485_v19, %v484_v6  ;;  %v521_v35 = vadd.f32 %v520_v24, %v433_v15  ;;  %v533_v36 = vadd.f32 %v532_v25, %v440_v3  ;;  %v544_v37 = vadd.f32 %v543_v26, %v446_v16  ;;  %v320_v25 = vld [vmem:[%s1679_s13 + $0x20] sm:$0xff]  ;;  %v321_v26 = vld [vmem:[%s1679_s13 + $0x28] sm:$0xff]  ;;  %s1960_s9 = scalar_lea.hbm %s2013_s4, %s1167_s26  ;;  %s1395_s6 = sshll.u32 %s1487_s18, 4  ;;  %s1396_s6 = int_to_ptr.vmem [resolvable:$false] %s1395_s6 }
  0x71   : > { %v498_v34 = vrot.slane %v497_v23, 4  ;;  %vm566_vm9 = vcmask 1042434   ;;  %v462_v41 = vadd.f32 %v461_v30, %v460_v17  ;;  %v474_v42 = vrot.slane %v473_v31, 2  ;;  %v323_v30 = vld [vmem:[%s1679_s13 + $0x38] sm:$0xff]  ;;  %p1398_p10 = scmp.lt.s32.totalorder %s1962_s11, %s1396_s6 }
  0x72   : > { %v487_v45 = vrot.slane %v486_v32, 2  ;;  %v510_v46 = vadd.f32 %v509_v33, %v427_v22  ;;  %vm568_vm10 = vcmask 1043459   ;;  %v522_v44 = vadd.f32 %v521_v35, %v434_v27 }
  0x73   : > { %1243 = vmatpush3.bf16.msk.msra.mxu0 %vm1242_vm4, %v1486_v20  ;;  %v499_v43 = vadd.f32 %v498_v34, %v497_v23  ;;  %v534_v47 = vadd.f32 %v533_v36, %v441_v28  ;;  %v545_v48 = vadd.f32 %v544_v37, %v447_v29  ;;  %v463_v51 = vrot.slane %v462_v41, 1  ;;  %v322_v29 = vld [vmem:[%s1679_s13 + $0x30] sm:$0xff] }
  0x74   : > { %1244 = vmatprep.subr.bf16.mxu0 %v1483_v1  ;;  %v475_v52 = vadd.f32 %v474_v42, %v473_v31  ;;  %v488_v53 = vadd.f32 %v487_v45, %v486_v32  ;;  %v511_v54 = vrot.slane %v510_v46, 4  ;;  %vm570_vm12 = vcmask 1044484  }
  0x75   : > { %v500_v56 = vrot.slane %v499_v43, 2  ;;  %v535_v57 = vadd.f32 %v534_v47, %v442_v39  ;;  %v546_v58 = vadd.f32 %v545_v48, %v448_v40  ;;  %v464_v62 = vadd.f32 %v463_v51, %v462_v41 }
  0x76   : > { %v476_v63 = vrot.slane %v475_v52, 1  ;;  %v489_v0 = vrot.slane %v488_v53, 1  ;;  %v512_v2 = vadd.f32 %v511_v54, %v510_v46  ;;  %vm572_vm13 = vcmask 1045509   ;;  %v324_v46 = vld [vmem:[%s1679_s13 + $0x40] sm:$0xff] }
  0x77   : > { %1246 = vmatpush3.bf16.msk.msra.mxu0 %vm1245_vm7, %v1486_v20  ;;  %v501_v4 = vadd.f32 %v500_v56, %v499_v43  ;;  %v536_v6 = vadd.f32 %v535_v57, %v443_v49  ;;  %v547_v7 = vadd.f32 %v546_v58, %v449_v50  ;;  %v332_v55 = vadd.f32 %v317_v60, %v316_v59  ;;  %v325_v43 = vld [vmem:[%s1679_s13 + $0x48] sm:$0xff]  ;;  %v326_v56 = vld [vmem:[%s1679_s13 + $0x50] sm:$0xff] }
  0x78   : > { %1247 = vmatprep.subr.bf16.mxu0 %v1483_v1  ;;  %v523_v1 = vadd.f32 %v522_v44, %v435_v38  ;;  %v477_v12 = vadd.f32 %v476_v63, %v475_v52  ;;  %v490_v13 = vadd.f32 %v489_v0, %v488_v53  ;;  %v513_v14 = vrot.slane %v512_v2, 2  ;;  %v328_v0 = vld [vmem:[%s1679_s13 + $0x60] sm:$0xff] }
  0x79   : > { %v537_v15 = vrot.slane %v536_v6, 4  ;;  %v548_v3 = vadd.f32 %v547_v7, %v450_v61  ;;  %vm574_vm14 = vcmask 1046534   ;;  %v333_v18 = vrot.slane %v332_v55, 4 }
  0x7a   : > { %v524_v5 = vrot.slane %v523_v1, 4  ;;  %v514_v16 = vadd.f32 %v513_v14, %v512_v2  ;;  %v848_v17 = vsel %vm564_vm8, %v477_v12, %v464_v62  ;;  %v339_v19 = vadd.f32 %v319_v10, %v318_v9  ;;  %v329_v2 = vld [vmem:[%s1679_s13 + $0x68] sm:$0xff] }
  0x7b   : > { %1249 = vmatpush3.bf16.msk.msra.mxu0 %vm1248_vm11, %v1486_v20  ;;  %v502_v20 = vrot.slane %v501_v4, 1  ;;  %v538_v23 = vadd.f32 %v537_v15, %v536_v6  ;;  %v549_v24 = vadd.f32 %v548_v3, %v451_v11  ;;  %v849_v28 = vsel %vm566_vm9, %v490_v13, %v848_v17  ;;  %v331_v6 = vld [vmem:[%s1679_s13 + $0x78] sm:$0xff] }
  0x7c   : > { %v525_v8 = vadd.f32 %v524_v5, %v523_v1  ;;  %v515_v27 = vrot.slane %v514_v16, 1  ;;  %v334_v31 = vadd.f32 %v333_v18, %v332_v55  ;;  %v340_v32 = vrot.slane %v339_v19, 4  ;;  %v327_v1 = vld [vmem:[%s1679_s13 + $0x58] sm:$0xff]  ;;  %v330_v5 = vld [vmem:[%s1679_s13 + $0x70] sm:$0xff] }
  0x7d   : > { %v503_v21 = vadd.f32 %v502_v20, %v501_v4  ;;  %v539_v34 = vrot.slane %v538_v23, 2  ;;  %v550_v35 = vrot.slane %v549_v24, 4  ;;  %vm576_vm15 = vcmask 1047559  }
  0x7e   : > { %v526_v22 = vrot.slane %v525_v8, 2  ;;  %v516_v37 = vadd.f32 %v515_v27, %v514_v16  ;;  %v335_v38 = vrot.slane %v334_v31, 2  ;;  %v341_v39 = vadd.f32 %v340_v32, %v339_v19 }
  0x7f   : > { %v850_v36 = vsel %vm568_vm10, %v503_v21, %v849_v28  ;;  %v346_v40 = vadd.f32 %v321_v26, %v320_v25  ;;  %v540_v42 = vadd.f32 %v539_v34, %v538_v23  ;;  %v551_v45 = vadd.f32 %v550_v35, %v549_v24 }
  0x80   : > { %v527_v33 = vadd.f32 %v526_v22, %v525_v8  ;;  %v353_v44 = vadd.f32 %v323_v30, %v322_v29  ;;  %v851_v47 = vsel %vm570_vm12, %v516_v37, %v850_v36  ;;  %v336_v48 = vadd.f32 %v335_v38, %v334_v31 }
  0x81   : > { %v342_v49 = vrot.slane %v341_v39, 2  ;;  %v347_v50 = vrot.slane %v346_v40, 4  ;;  %v541_v52 = vrot.slane %v540_v42, 1  ;;  %v552_v53 = vrot.slane %v551_v45, 2 }
  0x82   : > { %v528_v41 = vrot.slane %v527_v33, 1  ;;  %v354_v54 = vrot.slane %v353_v44, 4  ;;  %v337_v57 = vrot.slane %v336_v48, 1  ;;  %v360_v60 = vadd.f32 %v325_v43, %v324_v46 }
  0x83   : > { %v343_v58 = vadd.f32 %v342_v49, %v341_v39  ;;  %v348_v59 = vadd.f32 %v347_v50, %v346_v40  ;;  %v542_v61 = vadd.f32 %v541_v52, %v540_v42  ;;  %v553_v62 = vadd.f32 %v552_v53, %v551_v45 }
  0x84   : > { %v529_v51 = vadd.f32 %v528_v41, %v527_v33  ;;  %v355_v4 = vadd.f32 %v354_v54, %v353_v44  ;;  %v338_v7 = vadd.f32 %v337_v57, %v336_v48  ;;  %v361_v11 = vrot.slane %v360_v60, 4 }
  0x85   : > { %v344_v9 = vrot.slane %v343_v58, 1  ;;  %v349_v10 = vrot.slane %v348_v59, 2  ;;  %v554_v12 = vrot.slane %v553_v62, 1  ;;  %v367_v55 = vadd.f32 %v327_v1, %v326_v56 }
  0x86   : > { %v852_v63 = vsel %vm572_vm13, %v529_v51, %v851_v47  ;;  %v356_v14 = vrot.slane %v355_v4, 2  ;;  %v362_v15 = vadd.f32 %v361_v11, %v360_v60  ;;  %v374_v3 = vadd.f32 %v329_v2, %v328_v0 }
  0x87   : > { %v853_v13 = vsel %vm574_vm14, %v542_v61, %v852_v63  ;;  %v345_v20 = vadd.f32 %v344_v9, %v343_v58  ;;  %v350_v8 = vadd.f32 %v349_v10, %v348_v59  ;;  %v555_v16 = vadd.f32 %v554_v12, %v553_v62  ;;  %v936_v62 = vld [vmem:[%s309_s24] sm:$0xff] }
  0x88   : > { %v357_v17 = vadd.f32 %v356_v14, %v355_v4  ;;  %v368_v18 = vrot.slane %v367_v55, 4  ;;  %v381_v19 = vadd.f32 %v331_v6, %v330_v5  ;;  %v363_v22 = vrot.slane %v362_v15, 2  ;;  %v950_v5 = vld [vmem:[%s315_s14] sm:$0xff]  ;;  %s975_s14 = scalar_lea.sflag [#allocation4], %s1675_s25 }
  0x89   : > { %v351_v21 = vrot.slane %v350_v8, 1  ;;  %v375_v23 = vrot.slane %v374_v3, 4  ;;  %v565_v24 = vsel %vm564_vm8, %v345_v20, %v338_v7  ;;  %v854_v25 = vsel %vm576_vm15, %v555_v16, %v853_v13 }
  0x8a   : > { %v358_v26 = vrot.slane %v357_v17, 1  ;;  %v369_v27 = vadd.f32 %v368_v18, %v367_v55  ;;  %v382_v28 = vrot.slane %v381_v19, 4  ;;  %1224 = vmatmul.mubr.f32.vlgmr.msra.gmra.mrb[0].mxu0 %v854_v25  ;;  %v364_v30 = vadd.f32 %v363_v22, %v362_v15 }
  0x8b   : > { %v352_v29 = vadd.f32 %v351_v21, %v350_v8  ;;  %v376_v31 = vadd.f32 %v375_v23, %v374_v3  ;;  %vm938_vm0 = vcmask 7168   ;;  %vm953_vm1 = vcmask 31744  }
  0x8c   : > { %v359_v32 = vadd.f32 %v358_v26, %v357_v17  ;;  %v370_v33 = vrot.slane %v369_v27, 2  ;;  %v383_v34 = vadd.f32 %v382_v28, %v381_v19  ;;  %v365_v35 = vrot.slane %v364_v30, 1 }
  0x8d   : > { %v377_v36 = vrot.slane %v376_v31, 2  ;;  %v567_v37 = vsel %vm566_vm9, %v352_v29, %v565_v24 }
  0x8e   : > { %v371_v38 = vadd.f32 %v370_v33, %v369_v27  ;;  %v384_v39 = vrot.slane %v383_v34, 2  ;;  %v569_v40 = vsel %vm568_vm10, %v359_v32, %v567_v37  ;;  %v366_v41 = vadd.f32 %v365_v35, %v364_v30 }
  0x8f   : > { %v378_v42 = vadd.f32 %v377_v36, %v376_v31 }
  0x90   : > { %v372_v45 = vrot.slane %v371_v38, 1  ;;  %v385_v46 = vadd.f32 %v384_v39, %v383_v34  ;;  %v571_v44 = vsel %vm570_vm12, %v366_v41, %v569_v40 }
  0x91   : > { %v379_v43 = vrot.slane %v378_v42, 1 }
  0x92   : > { %v373_v47 = vadd.f32 %v372_v45, %v371_v38  ;;  %v386_v48 = vrot.slane %v385_v46, 1 }
  0x93   : > { %v380_v49 = vadd.f32 %v379_v43, %v378_v42 }
  0x94   : > { %v387_v50 = vadd.f32 %v386_v48, %v385_v46  ;;  %v573_v51 = vsel %vm572_vm13, %v373_v47, %v571_v44 }
  0x95   : > { %v575_v52 = vsel %vm574_vm14, %v380_v49, %v573_v51 }
  0x96   : > { %v577_v53 = vsel %vm576_vm15, %v387_v50, %v575_v52 }
  0x97   : > { %579 = vadd.xlane.f32.xlu0 %v577_v53 }
 0x124   : > { %v580_v54 = vpop.xlane.xlu0 %579 }
 0x125   : > { %v926_v56 = vmul.f32 0.00048828125, %v580_v54 }
 0x127   : > { %v928_v1 = vsub.f32 %v926_v56, %v926_v56 }
 0x129   : > { %v929_v57 = vmul.f32 1.442695, %v928_v1 }
 0x12b   : > { %1327 = vpow2.f32 %v929_v57 }
 0x135   : > { %v1328_v58 = vpop.eup %1327 }
 0x136   : > { %1329 = vlog2.f32 %v1328_v58 }
 0x140   : > { %v1330_v59 = vpop.eup %1329 }
 0x141   : > { %v933_v60 = vmul.f32 0.6931472, %v1330_v59 }
 0x143   : > { %v934_v61 = vadd.f32 %v933_v60, %v926_v56 }
 0x145   : > { %v935_v63 = vsub.f32 %v926_v56, %v934_v61 }
 0x147   : > { %v937_v0 = vmul.f32 %v936_v62, %v935_v63 }
 0x149   : > { %v939_v2 = vsel %vm938_vm0, %v937_v0, 0.0 }
 0x14a   : > { %940 = vadd.xlane.f32.xlu0 %v939_v2 }
 0x15d   : > { %v922_v4 = vpop.f32.mrb[0].mxu0 }
 0x15e   : > { %v927_v6 = vmul.f32 0.00048828125, %v922_v4  ;;  %v1225_v7 = vpop.f32.mrb[1].mxu0 }
 0x160   : > { %v951_v9 = vsub.f32 %v927_v6, %v950_v5 }
 0x162   : > { %v952_v10 = vand.u32 2147483647, %v951_v9 }
 0x164   : > { %v954_v11 = vsel %vm953_vm1, %v952_v10, 0.0 }
 0x165   : > { %955 = vadd.xlane.f32.xlu1 %v954_v11 }
 0x1d7   : > { %v941_v12 = vpop.xlane.xlu0 %940 }
 0x1d8   : > { %v942_v13 = vrot.slane %v941_v12, 4 }
 0x1da   : > { %v943_v14 = vadd.f32 %v942_v13, %v941_v12 }
 0x1dc   : > { %v944_v55 = vrot.slane %v943_v14, 2 }
 0x1de   : > { %v945_v20 = vadd.f32 %v944_v55, %v943_v14 }
 0x1e0   : > { %v946_v8 = vrot.slane %v945_v20, 1 }
 0x1e2   : > { %v947_v15 = vadd.f32 %v946_v8, %v945_v20 }
 0x1e4   : > { %1250 = vpush %v947_v15 }
 0x1f2   : > { %v956_v3 = vpop.xlane.xlu1 %955 }
 0x1f3   : > { %v957_v16 = vrot.slane %v956_v3, 4 }
 0x1f5   : > { %v958_v17 = vadd.f32 %v957_v16, %v956_v3 }
 0x1f7   : > { %v959_v18 = vrot.slane %v958_v17, 2 }
 0x1f9   : > { %v960_v19 = vadd.f32 %v959_v18, %v958_v17 }
 0x1fb   : > { %v961_v21 = vrot.slane %v960_v19, 1 }
 0x1fd   : > { %v962_v22 = vadd.f32 %v961_v21, %v960_v19 }
 0x1ff   : > { %1252 = vpush %v962_v22 }
 0x215   : > { %s1251_s12 = spop %1250 }
 0x216   : > { %s949_s7 = ssub.f32 0.0, %s1251_s12  ;;  %s1391_s12 = scalar_lea.vmem %s1962_s11, 128 }
 0x217   : > { %p1392_p3 = scmp.ne.s32.totalorder %s1962_s11, %s1391_s12 }
 0x218   : > { %s966_s22 = smul.f32 0.0625, %s949_s7  ;;  %s1397_s7 = scalar_lea.vmem %s1396_s6, 256 }
 0x219   : > { %p1393_p13 = pnand %p1392_p3, %p2054_p12  ;;  %p1399_p9 = scmp.lt.s32.totalorder %s1397_s7, %s1391_s12 }
 0x21b   : > { %p1394_p7 = pneg %p1393_p13  ;;  %p1400_p11 = por %p1399_p9, %p1398_p10 }
 0x21d   : > { %p1401_p1 = pnand %p1400_p11, %p1394_p7 }
 0x230   : > { %s1253_s13 = spop %1252 }
 0x231   : > { %s967_s5 = smul.f32 100.0, %s1253_s13 }
 0x233   : > { %s970_s27 = smul.f32 0.015625, %s967_s5 }
 0x235   : > { %s971_s10 = sadd.f32 %s970_s27, %s966_s22 }
 0x237   : > { %v972_v23 = vstv %s971_s10 }
 0x238   : > { %973 = vst [vmem:[%s303_s8] sm:$0xff] %v972_v23 }
 0x239   : > { %1404 = shalt.err (!%p1401_p1)
}
 0x23a   : > { %s1405_s25 = scalar_lea.hbm %s1960_s9, 128  ;;  %s1409_s22 = scalar_lea.hbm %s2013_s4, 256 }
 0x23b   : > { %p1406_p6 = scmp.ne.s32.totalorder %s1960_s9, %s1405_s25  ;;  %p1410_p4 = scmp.lt.u32.totalorder %s1960_s9, %s2013_s4 }
 0x23c   : > { %p1411_p8 = scmp.lt.u32.totalorder %s1409_s22, %s1405_s25  ;;  %p1413_p3 = scmp.lt.u32.totalorder %s1405_s25, %s1960_s9 }
 0x23d   : > { %p1407_p2 = pnand %p1406_p6, %p2054_p12 }
 0x23e   : > { %p1412_p0 = por %p1411_p8, %p1410_p4 }
 0x23f   : > { %p1408_p5 = pneg %p1407_p2 }
 0x240   : > { %p1414_p13 = por %p1413_p3, %p1412_p0 }
 0x242   : > { %p1415_p7 = pnand %p1414_p13, %p1408_p5 }
 0x244   : > { %1418 = shalt.err (!%p1415_p7)
}
 0x245   : > { %1258 = dma.vmem_to_hbm [thread:$0]  (%p2054_p12), %s1962_s11, 128, %s1960_s9, %s975_s14  }
 0x246 PF: > { %s1000_s8 = sand.u32 1, %s1457_s15   ;;  %p2055_p10 = scmp.ne.s32.totalorder %s2020_s30, 0 }
 0x247   : > { %p2056_p9 = scmp.ge.s32.totalorder %s1477_s20, 2  ;;  %s1001_s10 = scalar_lea.sflag [#allocation4], %s1000_s8 }
 0x249   : > { %p1268_p11 = pnand %p2056_p9, %p2055_p10 }
 0x24b   : > { %1452 = dma.done.wait (!%p1268_p11), %s1001_s10, 128  }
 0x24c   : > { %1454 = vsyncadd (!%p1268_p11), %s1001_s10, 4294967168  ;;  %s23_s20 = sadd.s32 1, %s1477_s20   ;;  %s2057_s15 = smov %s1461_s16 }
 0x24d   : > { %p20_p1 = scmp.ge.s32.totalorder %s23_s20, 4   ;;  %s2058_s16 = smov %s1465_s17 }
 0x24e   : > { %s2059_s17 = smov %s1569_s29  ;;  %s2060_s18 = smov %s1473_s19 }
 0x24f   : > { %s2061_s19 = smov %s2063_s23  ;;  %22 = sbr.rel (!%p20_p1) target bundleno = 8 (0x8), region = 100 }
 0x256   :  { %1006 = vsyncpa [#allocation3], 1 }
 0x257   :  { %1008 = vsyncpa [#allocation3 + $0x1], 1 }
 0x258   :  { %1009 = vsyncpa [#allocation6], 1 }
 0x259   :  { %1011 = vsyncpa [#allocation6 + $0x1], 1 }
 0x25a   :  { %1012 = vsyncpa [#allocation4], 1 }
 0x25b   :  { %1014 = vsyncpa [#allocation4 + $0x1], 1 }

</bundles_post_ra>
